<compile_context>
chip_gen: v7x
topology: tpu7x:2x2x1
jax: 0.10.0
libtpu: 0.0.40
codegen_flags: <defaults>
</compile_context>

<pallas_src>
import jax
import jax.numpy as jnp
from jax import lax
from jax.experimental import pallas as pl
from jax.experimental.pallas import tpu as pltpu

THRESHOLD = 0.05  # fixed threshold used by the module's qat_ternary branch


def _round_up(x, m):
    return ((x + m - 1) // m) * m


def _pick_tile(size, max_tile, align):
    """Pick a tile (multiple of `align`, <= max_tile) balancing padding waste
    against tile size: largest power-of-two candidate whose padded extent is
    within ~12.5% of the minimum achievable padded extent."""
    max_tile = max(max_tile, align)
    cands = []
    c = align
    while c <= max_tile:
        cands.append(c)
        c *= 2
    if max_tile % align == 0 and max_tile not in cands:
        cands.append(max_tile)
    cands.sort()
    padded = [_round_up(size, c) for c in cands]
    min_padded = min(padded)
    tol = min_padded + max(min_padded // 8, 0)
    best = cands[0]
    for c, p in zip(cands, padded):
        if p <= tol:
            best = c
    return best


def ternary_quantize(weight, threshold=THRESHOLD, dtype=jnp.bfloat16):
    """TernaryQuantizeFunction.forward: +1 / -1 / 0 (strict >, <; ties -> 0).

    Emitted directly in the matmul compute dtype: {-1, 0, +1} are exactly
    representable in bf16 (or int8), so the narrowing cast is lossless while
    halving (or quartering) the weight bytes streamed by the matmul kernel.
    """
    pos = (weight > threshold).astype(dtype)
    neg = (weight < -threshold).astype(dtype)
    return pos - neg


def _binary_linear_kernel(x_ref, w_ref, o_ref, *acc_refs):
    # x_ref: (tm, tk), w_ref: (tn, tk)  -- both already quantized / cast to the
    # compute dtype in the wrapper; the kernel is a pure K-contraction on the
    # MXU (shared last axis, no transpose), f32 accumulation.
    partial_f32 = lax.dot_general(
        x_ref[...], w_ref[...],
        dimension_numbers=(((1,), (1,)), ((), ())),
        preferred_element_type=jnp.float32,
    )

    if not acc_refs:
        # Single K step: write straight to the output tile, no scratch copy.
        o_ref[...] = partial_f32.astype(o_ref.dtype)
        return

    acc_ref, = acc_refs
    k = pl.program_id(2)

    @pl.when(k == 0)
    def _init():
        acc_ref[...] = jnp.zeros_like(acc_ref)

    acc_ref[...] += partial_f32

    @pl.when(k == pl.num_programs(2) - 1)
    def _finalize():
        o_ref[...] = acc_ref[...].astype(o_ref.dtype)


def binary_linear(x, weight, threshold=THRESHOLD, *,
                  tm=512, tn=512, tk=1024, compute_dtype=jnp.bfloat16):
    """x: (B, in_features), weight: (out_features, in_features) -> (B, OUT).

    compute_dtype: dtype fed to the MXU.  The ternary weight cast is exact;
    casting x is the only numerics tradeoff (use jnp.float32 for a bit-tight
    match of the f32 reference).  Accumulation is always f32.
    """
    B, IN = x.shape
    OUT, IN_w = weight.shape
    assert IN == IN_w, "in_features mismatch"

    out_dtype = x.dtype
    if compute_dtype is None:
        compute_dtype = x.dtype

    # Pre-quantize once (outside the hot loop) and pre-cast activations once.
    w_q = ternary_quantize(weight, threshold, dtype=compute_dtype)
    x_c = x.astype(compute_dtype)

    # Padding-aware tile selection (sublane-aligned M, lane-dense N/K).
    tm_e = _pick_tile(B, tm, 8)
    tn_e = _pick_tile(OUT, tn, 128)
    tk_e = _pick_tile(IN, tk, 128)

    Bp = _round_up(B, tm_e)
    OUTp = _round_up(OUT, tn_e)
    INp = _round_up(IN, tk_e)

    # v7x shards "parallel" grid axes over 2 TensorCores: expose >= 2 blocks
    # on a parallel axis for small problems when we can do so cheaply.
    if Bp // tm_e == 1 and OUTp // tn_e == 1:
        if tn_e >= 256:
            tn_e //= 2
        elif tm_e >= 16:
            tm_e //= 2

    # Zero-padding is exact: padded K columns contribute 0, padded weight rows
    # quantize to 0, padded batch rows are sliced off afterwards.
    if (Bp, INp) != (B, IN):
        x_c = jnp.pad(x_c, ((0, Bp - B), (0, INp - IN)))
    if (OUTp, INp) != (OUT, IN):
        w_q = jnp.pad(w_q, ((0, OUTp - OUT), (0, INp - IN)))

    n_k = INp // tk_e
    grid = (Bp // tm_e, OUTp // tn_e, n_k)

    scratch_shapes = []
    if n_k > 1:
        scratch_shapes.append(pltpu.VMEM((tm_e, tn_e), jnp.float32))

    # VMEM budget from the actual double-buffered working set; capped at
    # 48 MiB so it is always safe on v7x (64 MiB/TC physical VMEM).
    c_bytes = jnp.dtype(compute_dtype).itemsize
    o_bytes = jnp.dtype(out_dtype).itemsize
    vmem_need = (2 * (tm_e * tk_e + tn_e * tk_e) * c_bytes
                 + 2 * tm_e * tn_e * o_bytes
                 + (tm_e * tn_e * 4 if n_k > 1 else 0))
    vmem_limit = int(min(max(32 << 20, vmem_need * 3 // 2), 48 << 20))

    out = pl.pallas_call(
        _binary_linear_kernel,
        out_shape=jax.ShapeDtypeStruct((Bp, OUTp), out_dtype),
        grid_spec=pltpu.PrefetchScalarGridSpec(
            num_scalar_prefetch=0,
            grid=grid,
            in_specs=[
                pl.BlockSpec((tm_e, tk_e), lambda i, j, k: (i, k)),  # x tile
                pl.BlockSpec((tn_e, tk_e), lambda i, j, k: (j, k)),  # w_q tile
            ],
            out_specs=pl.BlockSpec((tm_e, tn_e), lambda i, j, k: (i, j)),
            scratch_shapes=scratch_shapes,
        ),
        compiler_params=pltpu.CompilerParams(
            dimension_semantics=("parallel", "parallel", "arbitrary"),
            vmem_limit_bytes=vmem_limit,
        ),
    )(x_c, w_q)

    return out[:B, :OUT]


def binary_linear_ref(x, weight, threshold=THRESHOLD):
    """Pure-JAX f32 reference (module semantics) for correctness checking."""
    w_q = jnp.where(
        weight > threshold,
        1.0,
        jnp.where(weight < -threshold, -1.0, 0.0),
    ).astype(weight.dtype)
    return x @ w_q.T


if __name__ == "__main__":
    key = jax.random.PRNGKey(0)
    kx, kw, kx2, kw2 = jax.random.split(key, 4)

    # --- small shape matching the module's dense-layer convention -----------
    B, IN, OUT = 8, 32, 16
    x = jax.random.normal(kx, (B, IN), dtype=jnp.float32)
    # Module init is torch.rand((out, in)) * 0.01 (all below threshold -> all
    # zero quantized weight); use uniform(-0.1, 0.1) to exercise a non-trivial
    # ternary pattern.
    weight = jax.random.uniform(
        kw, (OUT, IN), dtype=jnp.float32, minval=-0.1, maxval=0.1
    )

    # Exact f32 MXU path (bit-tight vs. the f32 reference); single K step ->
    # no-scratch fast path.
    y = binary_linear(x, weight, compute_dtype=jnp.float32)
    jax.block_until_ready(y)
    y_ref = binary_linear_ref(x, weight)
    assert y.shape == (B, OUT)
    assert jnp.allclose(y, y_ref, atol=1e-5, rtol=1e-5), "f32 mismatch vs reference"

    # --- multi-tile grid (M=2, N=2, K=4), default bf16 MXU path -------------
    B2, IN2, OUT2 = 16, 1024, 256
    x2 = jax.random.normal(kx2, (B2, IN2), dtype=jnp.float32)
    w2 = jax.random.uniform(
        kw2, (OUT2, IN2), dtype=jnp.float32, minval=-0.1, maxval=0.1
    )
    y2 = binary_linear(x2, w2, tm=8, tn=128, tk=256)   # exercises accumulator path
    jax.block_until_ready(y2)

    # Numerics-matched reference: same bf16 operands, f32 accumulate.
    wq2 = ternary_quantize(w2, dtype=jnp.bfloat16)
    y2_matched = jnp.dot(
        x2.astype(jnp.bfloat16), wq2.T, preferred_element_type=jnp.float32
    ).astype(x2.dtype)
    assert y2.shape == (B2, OUT2)
    assert jnp.allclose(y2, y2_matched, atol=1e-3, rtol=1e-3), \
        "bf16 tiled mismatch vs matched reference"
    # Loose check against full-f32 module semantics (x bf16 cast is the only loss).
    y2_ref = binary_linear_ref(x2, w2)
    assert jnp.allclose(y2, y2_ref, atol=0.5, rtol=5e-2), \
        "bf16 tiled mismatch vs f32 reference"

    # --- default tiles (clamped to problem), single-K bf16 fast path --------
    y3 = binary_linear(x2, w2)
    jax.block_until_ready(y3)
    assert jnp.allclose(y3, y2_matched, atol=1e-3, rtol=1e-3), \
        "default-tile mismatch vs matched reference"

    print("KERNEL_OK")
</pallas_src>

<mosaic_0001>
module attributes {stable_mosaic.version = 11 : i64} {
  func.func @_binary_linear_kernel(%arg0: i32, %arg1: i32, %arg2: i32, %arg3: memref<8x128xf32, #tpu.memory_space<vmem>>, %arg4: memref<128x128xf32, #tpu.memory_space<vmem>>, %arg5: memref<8x128xf32, #tpu.memory_space<vmem>>) attributes {dimension_semantics = [#tpu.dimension_semantics<parallel>, #tpu.dimension_semantics<parallel>, #tpu.dimension_semantics<arbitrary>], iteration_bounds = array<i64: 1, 1, 1>, scalar_prefetch = 0 : i64, scratch_operands = 0 : i64, tpu.core_type = #tpu.core_type<tc>, window_params = [{transform_indices = @transform_0, window_bounds = array<i64: 8, 128>}, {transform_indices = @transform_1, window_bounds = array<i64: 128, 128>}, {transform_indices = @transform_2, window_bounds = array<i64: 8, 128>}]} {
    %c0 = arith.constant 0 : index
    %c0_0 = arith.constant 0 : index
    %0 = vector.load %arg3[%c0, %c0_0] : memref<8x128xf32, #tpu.memory_space<vmem>>, vector<8x128xf32>
    %c0_1 = arith.constant 0 : index
    %c0_2 = arith.constant 0 : index
    %1 = vector.load %arg4[%c0_1, %c0_2] : memref<128x128xf32, #tpu.memory_space<vmem>>, vector<128x128xf32>
    %cst = arith.constant dense<0.000000e+00> : vector<8x128xf32>
    %2 = tpu.matmul %0, %1, %cst {dimension_numbers = #tpu.dot_dimension_numbers<[1], [1], [0], [0], [0, 0, 1, 0], [], []>} : vector<8x128xf32>, vector<128x128xf32>, vector<8x128xf32> -> vector<8x128xf32>
    %c0_3 = arith.constant 0 : index
    %c0_4 = arith.constant 0 : index
    %3 = vector.load %arg5[%c0_3, %c0_4] : memref<8x128xf32, #tpu.memory_space<vmem>>, vector<8x128xf32>
    tpu.vector_store %arg5[%c0_3, %c0_4], %2 {strides = array<i32>} : memref<8x128xf32, #tpu.memory_space<vmem>>, vector<8x128xf32>,
    return
  }
  func.func @transform_0(%arg0: i32, %arg1: i32, %arg2: i32) -> (i32, i32) {
    %c0_i32 = arith.constant 0 : i32
    return %arg0, %arg2 : i32, i32
  }
  func.func @transform_1(%arg0: i32, %arg1: i32, %arg2: i32) -> (i32, i32) {
    %c0_i32 = arith.constant 0 : i32
    return %arg1, %arg2 : i32, i32
  }
  func.func @transform_2(%arg0: i32, %arg1: i32, %arg2: i32) -> (i32, i32) {
    %c0_i32 = arith.constant 0 : i32
    return %arg0, %arg1 : i32, i32
  }
}

</mosaic_0001>

<bundles_post_ra>
// kernel: tpu_custom_call.1
= control target key start
LH: loop header
LB: loop body
LE: loop exit
PB: predicated region body
PF: predicated region fallthrough
CT: control target
= control target key end

     0   :  { %7 = vsyncpa [#allocation3], 0  ;;  %s364_s0 = inlined_call_operand.hbm [shape: f32[8,128], index: 0, kind: input, shape index: {}]   ;;  %s365_s1 = inlined_call_operand.hbm [shape: f32[128,128], index: 1, kind: input, shape index: {}]   ;;  %s366_s2 = inlined_call_operand.hbm [shape: f32[8,128], index: 2, kind: output, shape index: {}]  }
   0x1   :  { %8 = vsyncpa [#allocation6], 0 }
   0x2   :  { %9 = vsyncpa [#allocation4], 0  ;;  %s298_s9 = smov [#allocation2]   ;;  %s299_s11 = smov [#allocation5]  }
   0x3   :  { %s16_s10 = sshll.u32 %s298_s9, 4  ;;  %s25_s12 = sshll.u32 %s299_s11, 4  ;;  %s17_s10 = int_to_ptr.vmem [resolvable:$true] %s16_s10  ;;  %s321_s12 = int_to_ptr.vmem [resolvable:$true] %s25_s12 }
   0x4   :  { %s226_s15 = scalar_lea.hbm %s364_s0, 128 }
   0x5   :  { %p227_p0 = scmp.ne.s32.totalorder %s364_s0, %s226_s15  ;;  %p230_p1 = scmp.lt.u32.totalorder %s226_s15, %s364_s0 }
   0x7   :  { %p232_p2 = pnand %p230_p1, %p227_p0 }
   0x9   :  { %235 = shalt.err (!%p232_p2)
}
   0xa   :  { %s236_s20 = scalar_lea.vmem %s17_s10, 128  ;;  %p241_p4 = scmp.lt.s32.totalorder %s17_s10, %s17_s10 }
   0xb   :  { %p237_p3 = scmp.ne.s32.totalorder %s17_s10, %s236_s20  ;;  %p242_p5 = scmp.lt.s32.totalorder %s236_s20, %s236_s20 }
   0xd   :  { %p243_p6 = por %p242_p5, %p241_p4 }
   0xf   :  { %p244_p7 = pnand %p243_p6, %p237_p3 }
  0x11   :  { %247 = shalt.err (!%p244_p7)
}
  0x12   :  { %19 = dma.hbm_to_vmem [thread:$0]  %s364_s0, 128, %s17_s10, [#allocation3]  }
  0x13   :  { %s248_s25 = scalar_lea.hbm %s365_s1, 2048 }
  0x14   :  { %p249_p8 = scmp.ne.s32.totalorder %s365_s1, %s248_s25  ;;  %p252_p9 = scmp.lt.u32.totalorder %s248_s25, %s365_s1 }
  0x16   :  { %p254_p10 = pnand %p252_p9, %p249_p8 }
  0x18   :  { %257 = shalt.err (!%p254_p10)
}
  0x19   :  { %s258_s30 = scalar_lea.vmem %s321_s12, 2048  ;;  %p263_p12 = scmp.lt.s32.totalorder %s321_s12, %s321_s12 }
  0x1a   :  { %p259_p11 = scmp.ne.s32.totalorder %s321_s12, %s258_s30  ;;  %p264_p13 = scmp.lt.s32.totalorder %s258_s30, %s258_s30 }
  0x1c   :  { %p265_p0 = por %p264_p13, %p263_p12 }
  0x1e   :  { %p266_p1 = pnand %p265_p0, %p259_p11 }
  0x20   :  { %269 = shalt.err (!%p266_p1)
}
  0x21   :  { %s300_s0 = smov 128   ;;  %s301_s3 = smov 8  }
  0x22   :  { %31 = dma.hbm_to_vmem [thread:$0]  %s365_s1, 2048, %s321_s12, [#allocation6], %s300_s0, %s300_s0, %s301_s3  }
  0x23   :  { %292 = dma.done.wait [#allocation3], 128  }
  0x24   :  { %293 = vsyncadd [#allocation3], 4294967168 }
  0x25   :  { %294 = dma.done.wait [#allocation6], 2048  }
  0x26   :  { %295 = vsyncadd [#allocation6], 4294965248  ;;  %v302_v0 = vmov 0.0|0.0   ;;  %vm303_vm0 = vmmov 0   ;;  %v304_v1 = vmov 0.0   ;;  %v39_v2 = vld [vmem:[#allocation5] sm:$0xff] }
  0x27   :  { %194 = vmatprep.subr.bf16.mxu0 %v302_v0  ;;  %191 = vmatprep.mubr.msk.f32.mxu0 %vm303_vm0, %v304_v1  ;;  %v40_v3 = vld [vmem:[#allocation5 + $0x8] sm:$0xff]  ;;  %v41_v5 = vld [vmem:[#allocation5 + $0x10] sm:$0xff]  ;;  %v42_v6 = vld [vmem:[#allocation5 + $0x18] sm:$0xff]  ;;  %s305_s1 = smov [#allocation7]  }
  0x28   :  { %v195_v4 = vpack.c.bf16 %v40_v3, %v39_v2  ;;  %v198_v7 = vpack.c.bf16 %v42_v6, %v41_v5  ;;  %v43_v8 = vld [vmem:[#allocation5 + $0x20] sm:$0xff]  ;;  %v44_v9 = vld [vmem:[#allocation5 + $0x28] sm:$0xff]  ;;  %v45_v11 = vld [vmem:[#allocation5 + $0x30] sm:$0xff]  ;;  %s132_s6 = sshll.u32 %s305_s1, 4  ;;  %s133_s6 = int_to_ptr.vmem [resolvable:$true] %s132_s6 }
  0x29   :  { %v201_v10 = vpack.c.bf16 %v44_v9, %v43_v8  ;;  %v46_v12 = vld [vmem:[#allocation5 + $0x38] sm:$0xff]  ;;  %v47_v14 = vld [vmem:[#allocation5 + $0x40] sm:$0xff]  ;;  %v48_v15 = vld [vmem:[#allocation5 + $0x48] sm:$0xff]  ;;  %s270_s7 = scalar_lea.vmem %s133_s6, 128  ;;  %p275_p3 = scmp.lt.s32.totalorder %s133_s6, %s133_s6 }
  0x2a   :  { %196 = vmatpush3.bf16.xpose.msra.mxu0 %v195_v4  ;;  %v204_v13 = vpack.c.bf16 %v46_v12, %v45_v11  ;;  %v207_v16 = vpack.c.bf16 %v48_v15, %v47_v14  ;;  %v49_v17 = vld [vmem:[#allocation5 + $0x50] sm:$0xff]  ;;  %v50_v18 = vld [vmem:[#allocation5 + $0x58] sm:$0xff]  ;;  %v51_v20 = vld [vmem:[#allocation5 + $0x60] sm:$0xff]  ;;  %p271_p2 = scmp.ne.s32.totalorder %s133_s6, %s270_s7  ;;  %p276_p4 = scmp.lt.s32.totalorder %s270_s7, %s270_s7 }
  0x2b   :  { %197 = vmatprep.subr.bf16.mxu0 %v302_v0  ;;  %v210_v19 = vpack.c.bf16 %v50_v18, %v49_v17  ;;  %v52_v21 = vld [vmem:[#allocation5 + $0x68] sm:$0xff]  ;;  %v53_v23 = vld [vmem:[#allocation5 + $0x70] sm:$0xff]  ;;  %v54_v24 = vld [vmem:[#allocation5 + $0x78] sm:$0xff] }
  0x2c   :  { %v213_v22 = vpack.c.bf16 %v52_v21, %v51_v20  ;;  %v216_v25 = vpack.c.bf16 %v54_v24, %v53_v23  ;;  %v38_v26 = vld [vmem:[#allocation2] sm:$0xff]  ;;  %p277_p5 = por %p276_p4, %p275_p3 }
  0x2e   :  { %p278_p6 = pnand %p277_p5, %p271_p2 }
  0x32   :  { %199 = vmatpush3.bf16.xpose.msra.mxu0 %v198_v7 }
  0x33   :  { %200 = vmatprep.subr.bf16.mxu0 %v302_v0 }
  0x3a   :  { %202 = vmatpush3.bf16.xpose.msra.mxu0 %v201_v10 }
  0x3b   :  { %203 = vmatprep.subr.bf16.mxu0 %v302_v0 }
  0x42   :  { %205 = vmatpush3.bf16.xpose.msra.mxu0 %v204_v13 }
  0x43   :  { %206 = vmatprep.subr.bf16.mxu0 %v302_v0 }
  0x4a   :  { %208 = vmatpush3.bf16.xpose.msra.mxu0 %v207_v16 }
  0x4b   :  { %209 = vmatprep.subr.bf16.mxu0 %v302_v0 }
  0x52   :  { %211 = vmatpush3.bf16.xpose.msra.mxu0 %v210_v19 }
  0x53   :  { %212 = vmatprep.subr.bf16.mxu0 %v302_v0 }
  0x5a   :  { %214 = vmatpush3.bf16.xpose.msra.mxu0 %v213_v22 }
  0x5b   :  { %215 = vmatprep.subr.bf16.mxu0 %v302_v0 }
  0x62   :  { %217 = vmatpush3.bf16.xpose.msra.mxu0 %v216_v25 }
  0x69   :  { %192 = vmatmul.mubr.f32.vlgmr.msra.gmra.mrb[0].mxu0 %v38_v26 }
 0x13c   :  { %v121_v27 = vpop.f32.mrb[0].mxu0 }
 0x13d   :  { %125 = vst [vmem:[#allocation7] sm:$0xff] %v121_v27  ;;  %v193_v28 = vpop.f32.mrb[1].mxu0 }
 0x13e   :  { %281 = shalt.err (!%p278_p6)
}
 0x13f   :  { %s282_s10 = scalar_lea.hbm %s366_s2, 128 }
 0x140   :  { %p283_p7 = scmp.ne.s32.totalorder %s366_s2, %s282_s10  ;;  %p286_p8 = scmp.lt.u32.totalorder %s282_s10, %s366_s2 }
 0x142   :  { %p288_p9 = pnand %p286_p8, %p283_p7 }
 0x144   :  { %291 = shalt.err (!%p288_p9)
}
 0x145   :  { %135 = dma.vmem_to_hbm [thread:$0]  %s133_s6, 128, %s366_s2, [#allocation4]  }
 0x146   :  { %296 = dma.done.wait [#allocation4], 128  }
 0x147   :  { %297 = vsyncadd [#allocation4], 4294967168 }
 0x148   :  { %139 = vsyncpa [#allocation3], 1 }
 0x149   :  { %140 = vsyncpa [#allocation6], 1 }
 0x14a   :  { %141 = vsyncpa [#allocation4], 1 }

</bundles_post_ra>
